<compile_context>
chip_gen: v5e
topology: v5e:2x2
jax: 0.10.0
libtpu: 0.0.40
codegen_flags: <defaults>
</compile_context>

<pallas_src>
from functools import partial

import numpy as np
import jax
import jax.numpy as jnp
from jax import lax
from jax.experimental import pallas as pl
from jax.experimental.pallas import tpu as pltpu

LN_EPS = 1e-5
_VMEM_LIMIT = 64 * 1024 * 1024  # above v5e's 16 MiB default scoped limit


# ---------------------------------------------------------------------------
# Shared math helpers (used both inside the kernels and by the JAX reference)
# ---------------------------------------------------------------------------
def _layernorm(x, gamma, beta, eps=LN_EPS):
    mu = jnp.mean(x, axis=-1, keepdims=True)
    var = jnp.mean(jnp.square(x - mu), axis=-1, keepdims=True)
    return (x - mu) * lax.rsqrt(var + eps) * gamma + beta


def _gelu(x):
    # TODO(synk): PyTorch F.gelu defaults to the exact erf form; the tanh
    # approximation is used (max abs deviation ~1e-3) to stay on ops with
    # guaranteed Mosaic lowerings. Reference below uses the same formula.
    c = 0.7978845608028654  # sqrt(2/pi)
    return 0.5 * x * (1.0 + jnp.tanh(c * (x + 0.044715 * x * x * x)))


# ---------------------------------------------------------------------------
# Fused  LayerNorm -> multi-head attention -> output projection -> +residual
# ---------------------------------------------------------------------------
def _prenorm_attn_kernel(x_ref, ctx_ref, gq_ref, bq_ref, gc_ref, bc_ref,
                         wq_ref, wkv_ref, wo_ref, bo_ref, out_ref, o_scr_ref,
                         *, heads, dim_head, compute_dtype):
    inner = heads * dim_head

    x = x_ref[...]          # (N, Dq) f32
    ctx = ctx_ref[...]      # (M, Dc) f32

    xn = _layernorm(x, gq_ref[...], bq_ref[...])
    cn = _layernorm(ctx, gc_ref[...], bc_ref[...])

    # Full-width projections for all heads at once (scale folded into Wq).
    q = jnp.dot(xn.astype(compute_dtype), wq_ref[...],
                preferred_element_type=jnp.float32)          # (N, inner)
    kv = jnp.dot(cn.astype(compute_dtype), wkv_ref[...],
                 preferred_element_type=jnp.float32)         # (M, 2*inner)
    k = kv[:, :inner]
    v = kv[:, inner:]

    # Per-head attention, statically unrolled (heads is small).
    for h in range(heads):
        sl = slice(h * dim_head, (h + 1) * dim_head)
        qh = q[:, sl]
        kh = k[:, sl]
        vh = v[:, sl]
        # contract last dims of both operands -> no K^T materialization
        sim = lax.dot_general(qh, kh, (((1,), (1,)), ((), ())),
                              preferred_element_type=jnp.float32)   # (N, M)
        m = jnp.max(sim, axis=-1, keepdims=True)
        p = jnp.exp(sim - m)
        l = jnp.sum(p, axis=-1, keepdims=True)
        oh = jnp.dot(p.astype(compute_dtype), vh.astype(compute_dtype),
                     preferred_element_type=jnp.float32)            # (N, d)
        # deferred softmax normalization on the small (N, d) head output
        o_scr_ref[:, sl] = oh * pl.reciprocal(l, approx=False)

    # Single lane-dense output projection over all heads + bias + residual.
    y = jnp.dot(o_scr_ref[...].astype(compute_dtype), wo_ref[...],
                preferred_element_type=jnp.float32) + bo_ref[...]   # (N, Dq)
    out_ref[...] = (y + x).astype(out_ref.dtype)


def prenorm_attention_block(x, context, params, *, heads, dim_head,
                            compute_dtype=jnp.float32):
    """PreNorm(Attention)(x, context=context) + x  as one pallas_call."""
    self_attn = context is None
    if self_attn:
        # PreNorm self-attention: context is the *normed* x -> reuse query LN.
        context = x
        gc, bc = params["ln_q_g"], params["ln_q_b"]
    else:
        gc, bc = params["ln_ctx_g"], params["ln_ctx_b"]

    B, N, dq = x.shape
    _, M, dc = context.shape
    inner = heads * dim_head
    scale = dim_head ** (-0.5)

    # lane-dense (in_dim, out_dim) weights; softmax scale folded into Wq
    wq = (params["wq"] * scale).astype(compute_dtype)   # (dq, inner)
    wkv = params["wkv"].astype(compute_dtype)           # (dc, 2*inner)
    wo = params["wo"].astype(compute_dtype)             # (inner, dq)
    bo = params["bo"]                                   # (1, dq)
    gq, bq = params["ln_q_g"], params["ln_q_b"]         # (1, dq)

    kernel = partial(_prenorm_attn_kernel, heads=heads, dim_head=dim_head,
                     compute_dtype=compute_dtype)

    flops = 2 * B * (N * dq * inner + M * dc * 2 * inner
                     + heads * 2 * N * M * dim_head + N * inner * dq)
    bytes_accessed = 4 * (2 * x.size + context.size) + 4 * (
        wq.size + wkv.size + wo.size + bo.size)
    cost = pl.CostEstimate(flops=int(flops),
                           transcendentals=int(B * heads * N * M),
                           bytes_accessed=int(bytes_accessed))

    return pl.pallas_call(
        kernel,
        out_shape=jax.ShapeDtypeStruct((B, N, dq), jnp.float32),
        grid=(B,),
        in_specs=[
            pl.BlockSpec((None, N, dq), lambda b: (b, 0, 0)),    # x
            pl.BlockSpec((None, M, dc), lambda b: (b, 0, 0)),    # context
            pl.BlockSpec((1, dq), lambda b: (0, 0)),             # LN_q gamma
            pl.BlockSpec((1, dq), lambda b: (0, 0)),             # LN_q beta
            pl.BlockSpec((1, dc), lambda b: (0, 0)),             # LN_ctx gamma
            pl.BlockSpec((1, dc), lambda b: (0, 0)),             # LN_ctx beta
            pl.BlockSpec((dq, inner), lambda b: (0, 0)),         # Wq (scaled)
            pl.BlockSpec((dc, 2 * inner), lambda b: (0, 0)),     # Wkv
            pl.BlockSpec((inner, dq), lambda b: (0, 0)),         # Wo
            pl.BlockSpec((1, dq), lambda b: (0, 0)),             # out bias
        ],
        out_specs=pl.BlockSpec((None, N, dq), lambda b: (b, 0, 0)),
        scratch_shapes=[pltpu.VMEM((N, inner), jnp.float32)],
        compiler_params=pltpu.CompilerParams(
            dimension_semantics=("parallel",),
            vmem_limit_bytes=_VMEM_LIMIT),
        cost_estimate=cost,
    )(x, context, gq, bq, gc, bc, wq, wkv, wo, bo)


# ---------------------------------------------------------------------------
# Fused  LayerNorm -> Linear -> GEGLU -> Linear -> +residual
# ---------------------------------------------------------------------------
def _prenorm_ff_kernel(x_ref, g_ref, b_ref, w1_ref, b1_ref, w2_ref, b2_ref,
                       out_ref, *, hidden, compute_dtype):
    x = x_ref[...]                                        # (rows, D)
    xn = _layernorm(x, g_ref[...], b_ref[...])
    h = jnp.dot(xn.astype(compute_dtype), w1_ref[...],
                preferred_element_type=jnp.float32) + b1_ref[...]   # (rows, 2H)
    a = h[:, :hidden]
    g = h[:, hidden:]
    hact = a * _gelu(g)                                   # GEGLU
    y = jnp.dot(hact.astype(compute_dtype), w2_ref[...],
                preferred_element_type=jnp.float32) + b2_ref[...]
    out_ref[...] = (y + x).astype(out_ref.dtype)


def prenorm_feedforward_block(x, params, *, compute_dtype=jnp.float32,
                              max_rows_per_tile=512):
    """PreNorm(FeedForward)(x) + x  as one pallas_call over (B*N) row tiles."""
    B, N, D = x.shape
    hidden = params["w1"].shape[1] // 2
    rows = B * N
    x2 = x.reshape(rows, D)                 # pack batch into the sublane dim

    tile = rows if rows <= max_rows_per_tile else max_rows_per_tile
    grid = (pl.cdiv(rows, tile),)

    w1 = params["w1"].astype(compute_dtype)     # (D, 2*hidden)
    b1 = params["b1"]                           # (1, 2*hidden)
    w2 = params["w2"].astype(compute_dtype)     # (hidden, D)
    b2 = params["b2"]                           # (1, D)
    g, b = params["ln_g"], params["ln_b"]       # (1, D)

    kernel = partial(_prenorm_ff_kernel, hidden=hidden,
                     compute_dtype=compute_dtype)

    flops = 2 * rows * (D * 2 * hidden + hidden * D)
    cost = pl.CostEstimate(
        flops=int(flops),
        transcendentals=int(rows * hidden),
        bytes_accessed=int(4 * (2 * x2.size + w1.size + w2.size)))

    out = pl.pallas_call(
        kernel,
        out_shape=jax.ShapeDtypeStruct((rows, D), jnp.float32),
        grid=grid,
        in_specs=[
            pl.BlockSpec((tile, D), lambda i: (i, 0)),           # x rows
            pl.BlockSpec((1, D), lambda i: (0, 0)),              # LN gamma
            pl.BlockSpec((1, D), lambda i: (0, 0)),              # LN beta
            pl.BlockSpec((D, 2 * hidden), lambda i: (0, 0)),     # W1
            pl.BlockSpec((1, 2 * hidden), lambda i: (0, 0)),     # b1
            pl.BlockSpec((hidden, D), lambda i: (0, 0)),         # W2
            pl.BlockSpec((1, D), lambda i: (0, 0)),              # b2
        ],
        out_specs=pl.BlockSpec((tile, D), lambda i: (i, 0)),
        compiler_params=pltpu.CompilerParams(
            dimension_semantics=("parallel",),
            vmem_limit_bytes=_VMEM_LIMIT),
        cost_estimate=cost,
    )(x2, g, b, w1, b1, w2, b2)
    return out.reshape(B, N, D)


# ---------------------------------------------------------------------------
# PerceiverIO forward (pe=False path; mask is unused by the reference module)
# ---------------------------------------------------------------------------
def perceiver_io_pallas(params, data, queries, *, cross_heads, cross_dim_head,
                        latent_heads, latent_dim_head,
                        compute_dtype=jnp.float32):
    # TODO(synk): ConvPosEnc (pe=True) path not implemented (module default pe=False).
    x = queries
    x = prenorm_attention_block(x, data, params["cross_attn"],
                                heads=cross_heads, dim_head=cross_dim_head,
                                compute_dtype=compute_dtype)
    x = prenorm_feedforward_block(x, params["cross_ff"],
                                  compute_dtype=compute_dtype)
    for layer in params["layers"]:
        x = prenorm_attention_block(x, None, layer["attn"],
                                    heads=latent_heads,
                                    dim_head=latent_dim_head,
                                    compute_dtype=compute_dtype)
        x = prenorm_feedforward_block(x, layer["ff"],
                                      compute_dtype=compute_dtype)
    return x


# ---------------------------------------------------------------------------
# Parameter construction (weights stored lane-dense as (in_dim, out_dim))
# ---------------------------------------------------------------------------
def _linear(key, in_dim, out_dim, bias=True):
    kw, kb = jax.random.split(key)
    bound = 1.0 / float(np.sqrt(in_dim))
    w = jax.random.uniform(kw, (in_dim, out_dim), jnp.float32, -bound, bound)
    b = (jax.random.uniform(kb, (1, out_dim), jnp.float32, -bound, bound)
         if bias else None)
    return w, b


def _attn_params(key, query_dim, context_dim, heads, dim_head,
                 with_context_norm):
    inner = heads * dim_head
    kq, kkv, ko, kg1, kb1, kg2, kb2 = jax.random.split(key, 7)
    wq, _ = _linear(kq, query_dim, inner, bias=False)
    wkv, _ = _linear(kkv, context_dim, 2 * inner, bias=False)
    wo, bo = _linear(ko, inner, query_dim, bias=True)
    p = {
        "wq": wq, "wkv": wkv, "wo": wo, "bo": bo,
        "ln_q_g": 1.0 + 0.1 * jax.random.normal(kg1, (1, query_dim), jnp.float32),
        "ln_q_b": 0.1 * jax.random.normal(kb1, (1, query_dim), jnp.float32),
    }
    if with_context_norm:
        p["ln_ctx_g"] = 1.0 + 0.1 * jax.random.normal(kg2, (1, context_dim), jnp.float32)
        p["ln_ctx_b"] = 0.1 * jax.random.normal(kb2, (1, context_dim), jnp.float32)
    return p


def _ff_params(key, dim, mult=4):
    hidden = dim * mult
    k1, k2, kg, kb = jax.random.split(key, 4)
    w1, b1 = _linear(k1, dim, 2 * hidden)
    w2, b2 = _linear(k2, hidden, dim)
    return {"w1": w1, "b1": b1, "w2": w2, "b2": b2,
            "ln_g": 1.0 + 0.1 * jax.random.normal(kg, (1, dim), jnp.float32),
            "ln_b": 0.1 * jax.random.normal(kb, (1, dim), jnp.float32)}


def init_perceiver_params(key, *, depth, dim, latent_dim, cross_heads,
                          latent_heads, cross_dim_head, latent_dim_head,
                          mult=4):
    keys = jax.random.split(key, 2 + 2 * depth)
    params = {
        "cross_attn": _attn_params(keys[0], latent_dim, dim, cross_heads,
                                   cross_dim_head, with_context_norm=True),
        "cross_ff": _ff_params(keys[1], latent_dim, mult),
        "layers": [],
    }
    for i in range(depth):
        params["layers"].append({
            "attn": _attn_params(keys[2 + 2 * i], latent_dim, latent_dim,
                                 latent_heads, latent_dim_head,
                                 with_context_norm=False),
            "ff": _ff_params(keys[3 + 2 * i], latent_dim, mult),
        })
    return params


# ---------------------------------------------------------------------------
# Pure-JAX reference mirroring the PyTorch module
# ---------------------------------------------------------------------------
def _attention_ref(x, context, p, heads, dim_head):
    inner = heads * dim_head
    q = x @ p["wq"]
    kv = context @ p["wkv"]
    k, v = kv[..., :inner], kv[..., inner:]
    B, N, _ = q.shape

    def split(t):
        b, n, _ = t.shape
        return t.reshape(b, n, heads, dim_head).transpose(0, 2, 1, 3)

    qh, kh, vh = split(q), split(k), split(v)
    sim = jnp.einsum("bhid,bhjd->bhij", qh, kh) * dim_head ** (-0.5)
    attn = jax.nn.softmax(sim, axis=-1)
    o = jnp.einsum("bhij,bhjd->bhid", attn, vh)
    o = o.transpose(0, 2, 1, 3).reshape(B, N, inner)
    return o @ p["wo"] + p["bo"]


def _ff_ref(x, p):
    hidden = p["w1"].shape[1] // 2
    h = x @ p["w1"] + p["b1"]
    a, g = h[..., :hidden], h[..., hidden:]
    return (a * _gelu(g)) @ p["w2"] + p["b2"]


def perceiver_io_ref(params, data, queries, *, cross_heads, cross_dim_head,
                     latent_heads, latent_dim_head):
    x = queries
    p = params["cross_attn"]
    xn = _layernorm(x, p["ln_q_g"], p["ln_q_b"])
    cn = _layernorm(data, p["ln_ctx_g"], p["ln_ctx_b"])
    x = _attention_ref(xn, cn, p, cross_heads, cross_dim_head) + x
    p = params["cross_ff"]
    x = _ff_ref(_layernorm(x, p["ln_g"], p["ln_b"]), p) + x
    for layer in params["layers"]:
        p = layer["attn"]
        xn = _layernorm(x, p["ln_q_g"], p["ln_q_b"])
        x = _attention_ref(xn, xn, p, latent_heads, latent_dim_head) + x
        p = layer["ff"]
        x = _ff_ref(_layernorm(x, p["ln_g"], p["ln_b"]), p) + x
    return x


if __name__ == "__main__":
    # Small deterministic config consistent with the module's forward.
    B, M, dim = 2, 16, 32            # data:    (batch, seq, channels)
    N, latent_dim = 8, 64            # latents: (batch, n_latents, latent_dim)
    depth = 2
    cross_heads, cross_dim_head = 1, 32
    latent_heads, latent_dim_head = 4, 16

    root = jax.random.PRNGKey(0)
    kp, kd, kq = jax.random.split(root, 3)

    params = init_perceiver_params(
        kp, depth=depth, dim=dim, latent_dim=latent_dim,
        cross_heads=cross_heads, latent_heads=latent_heads,
        cross_dim_head=cross_dim_head, latent_dim_head=latent_dim_head)

    data = jax.random.normal(kd, (B, M, dim), jnp.float32)
    queries = jax.random.normal(kq, (B, N, latent_dim), jnp.float32)

    out = perceiver_io_pallas(
        params, data, queries,
        cross_heads=cross_heads, cross_dim_head=cross_dim_head,
        latent_heads=latent_heads, latent_dim_head=latent_dim_head)
    out = jax.block_until_ready(out)

    ref = perceiver_io_ref(
        params, data, queries,
        cross_heads=cross_heads, cross_dim_head=cross_dim_head,
        latent_heads=latent_heads, latent_dim_head=latent_dim_head)

    np.testing.assert_allclose(np.asarray(out), np.asarray(ref),
                               rtol=1e-3, atol=1e-3)
    print("KERNEL_OK")
</pallas_src>

<mosaic_0001>
module attributes {stable_mosaic.version = 11 : i64} {
  func.func @_prenorm_attn_kernel(%arg0: i32, %arg1: memref<1x8x64xf32, #tpu.memory_space<vmem>>, %arg2: memref<1x16x32xf32, #tpu.memory_space<vmem>>, %arg3: memref<1x64xf32, #tpu.memory_space<vmem>>, %arg4: memref<1x64xf32, #tpu.memory_space<vmem>>, %arg5: memref<1x32xf32, #tpu.memory_space<vmem>>, %arg6: memref<1x32xf32, #tpu.memory_space<vmem>>, %arg7: memref<64x32xf32, #tpu.memory_space<vmem>>, %arg8: memref<32x64xf32, #tpu.memory_space<vmem>>, %arg9: memref<32x64xf32, #tpu.memory_space<vmem>>, %arg10: memref<1x64xf32, #tpu.memory_space<vmem>>, %arg11: memref<1x8x64xf32, #tpu.memory_space<vmem>>, %arg12: memref<8x32xf32, #tpu.memory_space<vmem>>) attributes {dimension_semantics = [#tpu.dimension_semantics<parallel>], iteration_bounds = array<i64: 2>, scalar_prefetch = 0 : i64, scratch_operands = 1 : i64, tpu.core_type = #tpu.core_type<tc>, window_params = [{transform_indices = @transform_0, window_bounds = array<i64: 1, 8, 64>}, {transform_indices = @transform_1, window_bounds = array<i64: 1, 16, 32>}, {pipeline_mode = #tpu.pipeline_mode<synchronous>, transform_indices = @transform_2, window_bounds = array<i64: 1, 64>}, {pipeline_mode = #tpu.pipeline_mode<synchronous>, transform_indices = @transform_3, window_bounds = array<i64: 1, 64>}, {pipeline_mode = #tpu.pipeline_mode<synchronous>, transform_indices = @transform_4, window_bounds = array<i64: 1, 32>}, {pipeline_mode = #tpu.pipeline_mode<synchronous>, transform_indices = @transform_5, window_bounds = array<i64: 1, 32>}, {pipeline_mode = #tpu.pipeline_mode<synchronous>, transform_indices = @transform_6, window_bounds = array<i64: 64, 32>}, {pipeline_mode = #tpu.pipeline_mode<synchronous>, transform_indices = @transform_7, window_bounds = array<i64: 32, 64>}, {pipeline_mode = #tpu.pipeline_mode<synchronous>, transform_indices = @transform_8, window_bounds = array<i64: 32, 64>}, {pipeline_mode = #tpu.pipeline_mode<synchronous>, transform_indices = @transform_9, window_bounds = array<i64: 1, 64>}, {transform_indices = @transform_10, window_bounds = array<i64: 1, 8, 64>}]} {
    %c0 = arith.constant 0 : index
    %c0_0 = arith.constant 0 : index
    %c0_1 = arith.constant 0 : index
    %0 = vector.load %arg1[%c0, %c0_0, %c0_1] : memref<1x8x64xf32, #tpu.memory_space<vmem>>, vector<1x8x64xf32>
    %1 = vector.shape_cast %0 : vector<1x8x64xf32> to vector<8x64xf32>
    %c0_2 = arith.constant 0 : index
    %c0_3 = arith.constant 0 : index
    %c0_4 = arith.constant 0 : index
    %2 = vector.load %arg2[%c0_2, %c0_3, %c0_4] : memref<1x16x32xf32, #tpu.memory_space<vmem>>, vector<1x16x32xf32>
    %3 = vector.shape_cast %2 : vector<1x16x32xf32> to vector<16x32xf32>
    %c0_5 = arith.constant 0 : index
    %c0_6 = arith.constant 0 : index
    %4 = vector.load %arg3[%c0_5, %c0_6] : memref<1x64xf32, #tpu.memory_space<vmem>>, vector<1x64xf32>
    %c0_7 = arith.constant 0 : index
    %c0_8 = arith.constant 0 : index
    %5 = vector.load %arg4[%c0_7, %c0_8] : memref<1x64xf32, #tpu.memory_space<vmem>>, vector<1x64xf32>
    %cst = arith.constant dense<0.000000e+00> : vector<8xf32>
    %6 = vector.multi_reduction <add>, %1, %cst [1] : vector<8x64xf32> to vector<8xf32>
    %7 = vector.shape_cast %6 : vector<8xf32> to vector<8x1xf32>
    %cst_9 = arith.constant 6.400000e+01 : f32
    %8 = vector.broadcast %cst_9 : f32 to vector<8x1xf32>
    %9 = arith.divf %7, %8 : vector<8x1xf32>
    %10 = vector.broadcast %9 : vector<8x1xf32> to vector<8x64xf32>
    %11 = arith.subf %1, %10 : vector<8x64xf32>
    %12 = arith.mulf %11, %11 : vector<8x64xf32>
    %cst_10 = arith.constant dense<0.000000e+00> : vector<8xf32>
    %13 = vector.multi_reduction <add>, %12, %cst_10 [1] : vector<8x64xf32> to vector<8xf32>
    %14 = vector.shape_cast %13 : vector<8xf32> to vector<8x1xf32>
    %cst_11 = arith.constant 6.400000e+01 : f32
    %15 = vector.broadcast %cst_11 : f32 to vector<8x1xf32>
    %16 = arith.divf %14, %15 : vector<8x1xf32>
    %17 = vector.broadcast %9 : vector<8x1xf32> to vector<8x64xf32>
    %18 = arith.subf %1, %17 : vector<8x64xf32>
    %cst_12 = arith.constant 9.99999974E-6 : f32
    %19 = vector.broadcast %cst_12 : f32 to vector<8x1xf32>
    %20 = arith.addf %16, %19 : vector<8x1xf32>
    %21 = math.rsqrt %20 : vector<8x1xf32>
    %22 = vector.broadcast %21 : vector<8x1xf32> to vector<8x64xf32>
    %23 = arith.mulf %18, %22 : vector<8x64xf32>
    %24 = vector.broadcast %4 : vector<1x64xf32> to vector<8x64xf32>
    %25 = arith.mulf %23, %24 : vector<8x64xf32>
    %26 = vector.broadcast %5 : vector<1x64xf32> to vector<8x64xf32>
    %27 = arith.addf %25, %26 : vector<8x64xf32>
    %c0_13 = arith.constant 0 : index
    %c0_14 = arith.constant 0 : index
    %28 = vector.load %arg5[%c0_13, %c0_14] : memref<1x32xf32, #tpu.memory_space<vmem>>, vector<1x32xf32>
    %c0_15 = arith.constant 0 : index
    %c0_16 = arith.constant 0 : index
    %29 = vector.load %arg6[%c0_15, %c0_16] : memref<1x32xf32, #tpu.memory_space<vmem>>, vector<1x32xf32>
    %cst_17 = arith.constant dense<0.000000e+00> : vector<16xf32>
    %30 = vector.multi_reduction <add>, %3, %cst_17 [1] : vector<16x32xf32> to vector<16xf32>
    %31 = vector.shape_cast %30 : vector<16xf32> to vector<16x1xf32>
    %cst_18 = arith.constant 3.200000e+01 : f32
    %32 = vector.broadcast %cst_18 : f32 to vector<16x1xf32>
    %33 = arith.divf %31, %32 : vector<16x1xf32>
    %34 = vector.broadcast %33 : vector<16x1xf32> to vector<16x32xf32>
    %35 = arith.subf %3, %34 : vector<16x32xf32>
    %36 = arith.mulf %35, %35 : vector<16x32xf32>
    %cst_19 = arith.constant dense<0.000000e+00> : vector<16xf32>
    %37 = vector.multi_reduction <add>, %36, %cst_19 [1] : vector<16x32xf32> to vector<16xf32>
    %38 = vector.shape_cast %37 : vector<16xf32> to vector<16x1xf32>
    %cst_20 = arith.constant 3.200000e+01 : f32
    %39 = vector.broadcast %cst_20 : f32 to vector<16x1xf32>
    %40 = arith.divf %38, %39 : vector<16x1xf32>
    %41 = vector.broadcast %33 : vector<16x1xf32> to vector<16x32xf32>
    %42 = arith.subf %3, %41 : vector<16x32xf32>
    %cst_21 = arith.constant 9.99999974E-6 : f32
    %43 = vector.broadcast %cst_21 : f32 to vector<16x1xf32>
    %44 = arith.addf %40, %43 : vector<16x1xf32>
    %45 = math.rsqrt %44 : vector<16x1xf32>
    %46 = vector.broadcast %45 : vector<16x1xf32> to vector<16x32xf32>
    %47 = arith.mulf %42, %46 : vector<16x32xf32>
    %48 = vector.broadcast %28 : vector<1x32xf32> to vector<16x32xf32>
    %49 = arith.mulf %47, %48 : vector<16x32xf32>
    %50 = vector.broadcast %29 : vector<1x32xf32> to vector<16x32xf32>
    %51 = arith.addf %49, %50 : vector<16x32xf32>
    %c0_22 = arith.constant 0 : index
    %c0_23 = arith.constant 0 : index
    %52 = vector.load %arg7[%c0_22, %c0_23] : memref<64x32xf32, #tpu.memory_space<vmem>>, vector<64x32xf32>
    %cst_24 = arith.constant dense<0.000000e+00> : vector<8x32xf32>
    %53 = tpu.matmul %27, %52, %cst_24 {dimension_numbers = #tpu.dot_dimension_numbers<[1], [0], [0], [1], [0, 0, 1, 1], [], []>} : vector<8x64xf32>, vector<64x32xf32>, vector<8x32xf32> -> vector<8x32xf32>
    %c0_25 = arith.constant 0 : index
    %c0_26 = arith.constant 0 : index
    %54 = vector.load %arg8[%c0_25, %c0_26] : memref<32x64xf32, #tpu.memory_space<vmem>>, vector<32x64xf32>
    %cst_27 = arith.constant dense<0.000000e+00> : vector<16x64xf32>
    %55 = tpu.matmul %51, %54, %cst_27 {dimension_numbers = #tpu.dot_dimension_numbers<[1], [0], [0], [1], [0, 0, 1, 1], [], []>} : vector<16x32xf32>, vector<32x64xf32>, vector<16x64xf32> -> vector<16x64xf32>
    %56 = vector.extract_strided_slice %55 {offsets = [0, 0], sizes = [16, 32], strides = [1, 1]} : vector<16x64xf32> to vector<16x32xf32>
    %57 = vector.extract_strided_slice %55 {offsets = [0, 32], sizes = [16, 32], strides = [1, 1]} : vector<16x64xf32> to vector<16x32xf32>
    %cst_28 = arith.constant dense<0.000000e+00> : vector<8x16xf32>
    %58 = tpu.matmul %53, %56, %cst_28 {dimension_numbers = #tpu.dot_dimension_numbers<[1], [1], [0], [0], [0, 0, 1, 0], [], []>} : vector<8x32xf32>, vector<16x32xf32>, vector<8x16xf32> -> vector<8x16xf32>
    %cst_29 = arith.constant dense<0xFF800000> : vector<8xf32>
    %59 = vector.multi_reduction <maximumf>, %58, %cst_29 [1] : vector<8x16xf32> to vector<8xf32>
    %60 = vector.shape_cast %59 : vector<8xf32> to vector<8x1xf32>
    %61 = vector.broadcast %60 : vector<8x1xf32> to vector<8x16xf32>
    %62 = arith.subf %58, %61 : vector<8x16xf32>
    %63 = math.exp %62 : vector<8x16xf32>
    %cst_30 = arith.constant dense<0.000000e+00> : vector<8xf32>
    %64 = vector.multi_reduction <add>, %63, %cst_30 [1] : vector<8x16xf32> to vector<8xf32>
    %65 = vector.shape_cast %64 : vector<8xf32> to vector<8x1xf32>
    %cst_31 = arith.constant dense<0.000000e+00> : vector<8x32xf32>
    %66 = tpu.matmul %63, %57, %cst_31 {dimension_numbers = #tpu.dot_dimension_numbers<[1], [0], [0], [1], [0, 0, 1, 1], [], []>} : vector<8x16xf32>, vector<16x32xf32>, vector<8x32xf32> -> vector<8x32xf32>
    %67 = tpu.reciprocal %65 : vector<8x1xf32> -> vector<8x1xf32>
    %68 = vector.broadcast %67 : vector<8x1xf32> to vector<8x32xf32>
    %69 = arith.mulf %66, %68 : vector<8x32xf32>
    %c0_32 = arith.constant 0 : index
    %c0_33 = arith.constant 0 : index
    %70 = vector.load %arg12[%c0_32, %c0_33] : memref<8x32xf32, #tpu.memory_space<vmem>>, vector<8x32xf32>
    tpu.vector_store %arg12[%c0_32, %c0_33], %69 {strides = array<i32>} : memref<8x32xf32, #tpu.memory_space<vmem>>, vector<8x32xf32>,
    %c0_34 = arith.constant 0 : index
    %c0_35 = arith.constant 0 : index
    %71 = vector.load %arg12[%c0_34, %c0_35] : memref<8x32xf32, #tpu.memory_space<vmem>>, vector<8x32xf32>
    %c0_36 = arith.constant 0 : index
    %c0_37 = arith.constant 0 : index
    %72 = vector.load %arg9[%c0_36, %c0_37] : memref<32x64xf32, #tpu.memory_space<vmem>>, vector<32x64xf32>
    %cst_38 = arith.constant dense<0.000000e+00> : vector<8x64xf32>
    %73 = tpu.matmul %71, %72, %cst_38 {dimension_numbers = #tpu.dot_dimension_numbers<[1], [0], [0], [1], [0, 0, 1, 1], [], []>} : vector<8x32xf32>, vector<32x64xf32>, vector<8x64xf32> -> vector<8x64xf32>
    %c0_39 = arith.constant 0 : index
    %c0_40 = arith.constant 0 : index
    %74 = vector.load %arg10[%c0_39, %c0_40] : memref<1x64xf32, #tpu.memory_space<vmem>>, vector<1x64xf32>
    %75 = vector.broadcast %74 : vector<1x64xf32> to vector<8x64xf32>
    %76 = arith.addf %73, %75 : vector<8x64xf32>
    %77 = arith.addf %76, %1 : vector<8x64xf32>
    %c0_41 = arith.constant 0 : index
    %c0_42 = arith.constant 0 : index
    %c0_43 = arith.constant 0 : index
    %78 = vector.load %arg11[%c0_41, %c0_42, %c0_43] : memref<1x8x64xf32, #tpu.memory_space<vmem>>, vector<1x8x64xf32>
    %79 = vector.shape_cast %78 : vector<1x8x64xf32> to vector<8x64xf32>
    %80 = vector.shape_cast %77 : vector<8x64xf32> to vector<1x8x64xf32>
    tpu.vector_store %arg11[%c0_41, %c0_42, %c0_43], %80 {strides = array<i32>} : memref<1x8x64xf32, #tpu.memory_space<vmem>>, vector<1x8x64xf32>,
    return
  }
  func.func @transform_0(%arg0: i32) -> (i32, i32, i32) {
    %c0_i32 = arith.constant 0 : i32
    %c0_i32_0 = arith.constant 0 : i32
    %c0_i32_1 = arith.constant 0 : i32
    return %arg0, %c0_i32, %c0_i32_0 : i32, i32, i32
  }
  func.func @transform_1(%arg0: i32) -> (i32, i32, i32) {
    %c0_i32 = arith.constant 0 : i32
    %c0_i32_0 = arith.constant 0 : i32
    %c0_i32_1 = arith.constant 0 : i32
    return %arg0, %c0_i32, %c0_i32_0 : i32, i32, i32
  }
  func.func @transform_2(%arg0: i32) -> (i32, i32) {
    %c0_i32 = arith.constant 0 : i32
    %c0_i32_0 = arith.constant 0 : i32
    %c0_i32_1 = arith.constant 0 : i32
    return %c0_i32, %c0_i32_0 : i32, i32
  }
  func.func @transform_3(%arg0: i32) -> (i32, i32) {
    %c0_i32 = arith.constant 0 : i32
    %c0_i32_0 = arith.constant 0 : i32
    %c0_i32_1 = arith.constant 0 : i32
    return %c0_i32, %c0_i32_0 : i32, i32
  }
  func.func @transform_4(%arg0: i32) -> (i32, i32) {
    %c0_i32 = arith.constant 0 : i32
    %c0_i32_0 = arith.constant 0 : i32
    %c0_i32_1 = arith.constant 0 : i32
    return %c0_i32, %c0_i32_0 : i32, i32
  }
  func.func @transform_5(%arg0: i32) -> (i32, i32) {
    %c0_i32 = arith.constant 0 : i32
    %c0_i32_0 = arith.constant 0 : i32
    %c0_i32_1 = arith.constant 0 : i32
    return %c0_i32, %c0_i32_0 : i32, i32
  }
  func.func @transform_6(%arg0: i32) -> (i32, i32) {
    %c0_i32 = arith.constant 0 : i32
    %c0_i32_0 = arith.constant 0 : i32
    %c0_i32_1 = arith.constant 0 : i32
    return %c0_i32, %c0_i32_0 : i32, i32
  }
  func.func @transform_7(%arg0: i32) -> (i32, i32) {
    %c0_i32 = arith.constant 0 : i32
    %c0_i32_0 = arith.constant 0 : i32
    %c0_i32_1 = arith.constant 0 : i32
    return %c0_i32, %c0_i32_0 : i32, i32
  }
  func.func @transform_8(%arg0: i32) -> (i32, i32) {
    %c0_i32 = arith.constant 0 : i32
    %c0_i32_0 = arith.constant 0 : i32
    %c0_i32_1 = arith.constant 0 : i32
    return %c0_i32, %c0_i32_0 : i32, i32
  }
  func.func @transform_9(%arg0: i32) -> (i32, i32) {
    %c0_i32 = arith.constant 0 : i32
    %c0_i32_0 = arith.constant 0 : i32
    %c0_i32_1 = arith.constant 0 : i32
    return %c0_i32, %c0_i32_0 : i32, i32
  }
  func.func @transform_10(%arg0: i32) -> (i32, i32, i32) {
    %c0_i32 = arith.constant 0 : i32
    %c0_i32_0 = arith.constant 0 : i32
    %c0_i32_1 = arith.constant 0 : i32
    return %arg0, %c0_i32, %c0_i32_0 : i32, i32, i32
  }
}

</mosaic_0001>

<bundles_post_ra>
// kernel: tpu_custom_call.1
= control target key start
LH: loop header
LB: loop body
LE: loop exit
PB: predicated region body
PF: predicated region fallthrough
CT: control target
= control target key end

     0   :  { %s1351_s0 = inlined_call_operand.hbm [shape: f32[2,8,64], index: 0, kind: input, shape index: {}]   ;;  %s1352_s1 = inlined_call_operand.vmem [shape: f32[2,16,32], index: 1, kind: input, shape index: {}]   ;;  %s1353_s2 = inlined_call_operand.vmem [shape: f32[1,64], index: 2, kind: input, shape index: {}]   ;;  %s1354_s3 = inlined_call_operand.hbm [shape: f32[1,64], index: 3, kind: input, shape index: {}]   ;;  %s1355_s4 = inlined_call_operand.vmem [shape: f32[1,32], index: 4, kind: input, shape index: {}]   ;;  %s1356_s5 = inlined_call_operand.vmem [shape: f32[1,32], index: 5, kind: input, shape index: {}]   ;;  %s1357_s6 = inlined_call_operand.vmem [shape: f32[64,32], index: 6, kind: input, shape index: {}]   ;;  %s1358_s7 = inlined_call_operand.vmem [shape: f32[32,64], index: 7, kind: input, shape index: {}]   ;;  %s1359_s8 = inlined_call_operand.vmem [shape: f32[32,64], index: 8, kind: input, shape index: {}]   ;;  %s1360_s9 = inlined_call_operand.vmem [shape: f32[1,64], index: 9, kind: input, shape index: {}]   ;;  %s1361_s10 = inlined_call_operand.hbm [shape: f32[2,8,64], index: 10, kind: output, shape index: {}]  }
   0x1   :  { %1365 = sst [smem:[#allocation15_spill]] %s1354_s3 }
   0x2   :  { %15 = vsyncpa [#allocation4], 0 }
   0x3   :  { %17 = vsyncpa [#allocation4 + $0x1], 0 }
   0x4   :  { %18 = vsyncpa [#allocation7], 0 }
   0x5   :  { %19 = vsyncpa [#allocation5], 0 }
   0x6   :  { %21 = vsyncpa [#allocation5 + $0x1], 0  ;;  %s1109_s13 = smov 0   ;;  %s1111_s14 = smov 0  }
   0x7   :  { %s1113_s15 = smov 0   ;;  %s1115_s16 = smov 0  }
   0x8 LB: > { %1366 = sst [smem:[#allocation12_spill]] %s1044_s15  ;;  %s1130_s17 = sadd.s32 4294967295, %s1048_s16   ;;  %s1048_s16 = sphi %s1115_s16, %s1376_s16   ;;  %s1044_s15 = sphi %s1113_s15, %s1378_s15   ;;  %s1040_s14 = sphi %s1111_s14, %s1380_s14   ;;  %s1036_s13 = sphi %s1109_s13, %s1379_s13  }
   0x9   : > { %s809_s18 = sadd.s32 4294967294, %s1048_s16   ;;  %p47_p0 = scmp.ne.s32.totalorder %s1040_s14, %s1036_s13 }
   0xa   : > { %p48_p1 = scmp.eq.s32.totalorder %s1130_s17, 0  ;;  %p265_p2 = scmp.eq.s32.totalorder %s1130_s17, 1 }
   0xb   : > { %p271_p3 = scmp.eq.s32.totalorder %s809_s18, 1  ;;  %p810_p5 = scmp.ge.s32.totalorder %s1048_s16, 1 }
   0xc   : > { %p1139_p4 = por %p48_p1, %p47_p0  ;;  %p278_p7 = scmp.lt.s32.totalorder %s1048_s16, 3 }
   0xd   : > { %p1144_p6 = por %p271_p3, %p47_p0  ;;  %s1369_s3 = sld [smem:[#allocation15_spill]] }
   0xe   : > { %p1152_p8 = pnand %p810_p5, %p278_p7  ;;  %s1050_s25 = smov [#allocation6]  }
   0xf   : > { %s295_s26 = sshll.u32 %s1050_s25, 4  ;;  %s1162_s27 = sadd.s32 1, %s1048_s16   ;;  %s296_s26 = int_to_ptr.vmem [resolvable:$true] %s295_s26 }
  0x10   : > { %p842_p10 = pneg %p1152_p8  ;;  %1371 = sst [smem:[#allocation13_spill]] %s1162_s27 }
  0x11   : > { %s34_s28 = sadd.s32 1, %s1044_s15  ;;  %s31_s29 = ssub.s32 %s1048_s16, %s1162_s27 }
  0x12   : > { %p843_p11 = pnand %p842_p10, %p48_p1  ;;  %p32_p12 = scmp.eq.s32.totalorder %s31_s29, 0 }
  0x13   : > { %s293_s23 = sshll.u32 %s1369_s3, 4  ;;  %p41_p13 = scmp.ne.s32.totalorder %s1044_s15, %s1040_s14  ;;  %s294_s23 = int_to_ptr.hbm [resolvable:$true] %s293_s23 }
  0x14   : > { %845 = dma.hbm_to_vmem [thread:$0]  (!%p843_p11), %s294_s23, 16, %s296_s26, [#allocation7]  }
  0x15   : > { %p42_p0 = scmp.eq.s32.totalorder %s1048_s16, 0  ;;  %p1175_p3 = por %p265_p2, %p41_p13 }
  0x16   : > { %s1171_s30 = scalar_select %p32_p12, %s1044_s15, %s34_s28  }
  0x17   : > { %p855_p5 = scmp.lt.s32.totalorder %s1048_s16, 2  ;;  %s324_s12 = sand.u32 1, %s1044_s15  }
  0x18   : > { %1372 = sst [smem:[#allocation14_spill]] %s1171_s30  ;;  %s814_s18 = sshll.u32 %s1048_s16, 3 }
  0x19   : > { %p43_p7 = por %p42_p0, %p41_p13  ;;  %s813_s21 = sshll.u32 %s324_s12, 3 }
  0x1a   : > { %s332_s3 = scalar_lea.hbm %s1351_s0, %s814_s18  ;;  %s328_s26 = scalar_lea.vmem [#allocation3], %s813_s21 }
  0x1b   : > { %s334_s23 = sshll.u32 %s332_s3, 4  ;;  %s336_s29 = sshll.u32 %s328_s26, 4  ;;  %s335_s23 = int_to_ptr.hbm [resolvable:$true] %s334_s23  ;;  %s337_s29 = int_to_ptr.vmem [resolvable:$true] %s336_s29 }
  0x1c   : > { %p1185_p10 = pnand %p855_p5, %p43_p7  ;;  %s325_s30 = scalar_lea.sflag [#allocation4], %s324_s12 }
  0x1d   : > { %s948_s27 = sshra.s32 %s335_s23, 4  ;;  %s955_s21 = scalar_lea.hbm %s1351_s0, 16  ;;  %s949_s27 = int_to_ptr.hbm [resolvable:$true] %s948_s27 }
  0x1e   : > { %s950_s15 = scalar_lea.hbm %s949_s27, 8  ;;  %p952_p11 = pneg %p1185_p10 }
  0x1f   : > { %p951_p2 = scmp.ne.s32.totalorder %s949_s27, %s950_s15  ;;  %p956_p0 = scmp.lt.s32.totalorder %s949_s27, %s1351_s0 }
  0x20   : > { %p957_p5 = scmp.lt.s32.totalorder %s955_s21, %s950_s15 }
  0x21   : > { %p953_p12 = pnand %p952_p11, %p951_p2 }
  0x22   : > { %p958_p7 = por %p957_p5, %p956_p0 }
  0x23   : > { %p954_p13 = pneg %p953_p12 }
  0x25   : > { %p959_p9 = pnand %p958_p7, %p954_p13 }
  0x27   : > { %962 = shalt.err (!%p959_p9)
}
  0x28   : > { %849 = dma.hbm_to_vmem [thread:$0]  (!%p1185_p10), %s335_s23, 128, %s337_s29, %s325_s30  }
  0x29   : > { %353 = sbr.rel (%p1152_p8) target bundleno = 1009 (0x3f1), region = 60  ;;  %s1202_s12 = sand.u32 (!%p1152_p8), 1, %s1040_s14  }
  0x2a   : > { %s816_s26 = sshll.u32 (!%p1152_p8), %s1202_s12, 3  ;;  %s356_s18 = scalar_lea.sflag (!%p1152_p8), [#allocation4], %s1202_s12 }
  0x2b   : > { %s359_s15 = scalar_lea.vmem (!%p1152_p8), [#allocation3], %s816_s26 }
  0x2e   : > { %1023 = dma.done.wait (%p1139_p4), %s356_s18, 128  }
  0x2f   : > { %1025 = vsyncadd (%p1139_p4), %s356_s18, 4294967168 }
  0x30   : > { %1027 = dma.done.wait (%p48_p1), [#allocation7], 16  }
  0x31   : > { %1029 = vsyncadd (%p48_p1), [#allocation7], 4294967280  ;;  %p407_p8 = scmp.lt.s32.totalorder %s1130_s17, 1  ;;  %vm457_vm0 = vcmask 261120   ;;  %vm417_vm1 = vcmask 523264   ;;  %v1221_v1 = vld [vmem:[%s359_s15] sm:$0xff] }
  0x32   : > { %v418_v3 = vsel %vm417_vm1, %v1221_v1, 0.0  ;;  %v1051_v6 = vmov 32.0   ;;  %v1052_v8 = vmov 64.0   ;;  %v553_v35 = vld [vmem:[%s1358_s7 + $0x18] sm:$0xff]  ;;  %v552_v36 = vld [vmem:[%s1358_s7 + $0x10] sm:$0xff]  ;;  %v551_v37 = vld [vmem:[%s1358_s7 + $0x8] sm:$0xff] }
  0x33   : > { %s408_s24 = scalar_select %p407_p8, %s1130_s17, 1  ;;  %419 = vadd.xlane.f32.xlu1 %v418_v3  ;;  %904 = vrcp.f32 %v1051_v6  ;;  %572 = vmatpush.msra.mxu1 %v553_v35  ;;  %v550_v38 = vld [vmem:[%s1358_s7] sm:$0xff]  ;;  %v526_v39 = vld [vmem:[%s1357_s6 + $0x38] sm:$0xff]  ;;  %v525_v40 = vld [vmem:[%s1357_s6 + $0x30] sm:$0xff]  ;;  %vm612_vm13 = vcmask 130048  }
  0x34   : > { %906 = vrcp.f32 %v1052_v8  ;;  %538 = vmatpush.msra.mxu0 %v526_v39  ;;  %v524_v43 = vld [vmem:[%s1357_s6 + $0x28] sm:$0xff]  ;;  %v523_v45 = vld [vmem:[%s1357_s6 + $0x20] sm:$0xff]  ;;  %v522_v46 = vld [vmem:[%s1357_s6 + $0x18] sm:$0xff]  ;;  %s1053_s22 = smov 96   ;;  %s830_s19 = sshll.u32 %s1130_s17, 3 }
  0x35   : > { %s833_s27 = sshll.u32 %s408_s24, 4  ;;  %573 = vmatpush.msra.mxu1 %v552_v36  ;;  %v521_v47 = vld [vmem:[%s1357_s6 + $0x10] sm:$0xff]  ;;  %v520_v48 = vld [vmem:[%s1357_s6 + $0x8] sm:$0xff]  ;;  %v519_v51 = vld [vmem:[%s1357_s6] sm:$0xff]  ;;  %s712_s25 = scalar_lea.hbm %s1361_s10, %s830_s19 }
  0x36   : > { %s411_s29 = scalar_lea.vmem %s1352_s1, %s833_s27  ;;  %539 = vmatpush.msra.mxu0 %v525_v40  ;;  %s406_s18 = scalar_lea.vmem [#allocation8], %s816_s26 }
  0x37   : > { %v413_v0 = vld [vmem:[%s411_s29] sm:$0xff]  ;;  %v414_v4 = vld [vmem:[%s411_s29 + $0x8] sm:$0xff]  ;;  %574 = vmatpush.msra.mxu1 %v551_v37  ;;  %s714_s15 = sshll.u32 %s406_s18, 4  ;;  %s716_s24 = sshll.u32 %s712_s25, 4  ;;  %s715_s15 = int_to_ptr.vmem [resolvable:$true] %s714_s15  ;;  %s717_s24 = int_to_ptr.hbm [resolvable:$true] %s716_s24 }
  0x38   : > { %v458_v2 = vsel %vm457_vm0, %v413_v0, 0.0  ;;  %v461_v5 = vsel %vm457_vm0, %v414_v4, 0.0  ;;  %540 = vmatpush.msra.mxu0 %v524_v43  ;;  %v669_v43 = vld [vmem:[%s1359_s8 + $0x8] sm:$0xff]  ;;  %s702_s17 = scalar_lea.sflag [#allocation5], %s1202_s12  ;;  %s992_s27 = sshra.s32 %s717_s24, 4  ;;  %s993_s27 = int_to_ptr.hbm [resolvable:$true] %s992_s27 }
  0x39   : > { %459 = vadd.xlane.f32.xlu0 %v458_v2  ;;  %v905_v7 = vpop.eup %904  ;;  %575 = vmatpush.msra.mxu1 %v550_v38  ;;  %s994_s30 = scalar_lea.hbm %s993_s27, 8  ;;  %s998_s26 = scalar_lea.hbm %s1361_s10, 16 }
  0x3a   : > { %v465_v9 = vmul.f32 32.0, %v905_v7  ;;  %v907_v11 = vpop.eup %906  ;;  %vm469_vm2 = vweird.f32 %v905_v7  ;;  %541 = vmatpush.msra.mxu0 %v523_v45  ;;  %p995_p1 = scmp.ne.s32.totalorder %s993_s27, %s994_s30  ;;  %p999_p10 = scmp.lt.s32.totalorder %s993_s27, %s1361_s10 }
  0x3b   : > { %v422_v13 = vmul.f32 64.0, %v907_v11  ;;  %vm426_vm3 = vweird.f32 %v907_v11  ;;  %p1000_p2 = scmp.lt.s32.totalorder %s998_s26, %s994_s30 }
  0x3c   : > { %v466_v10 = vsub.f32 1.0, %v465_v9  ;;  %542 = vmatpush.msra.mxu0 %v522_v46  ;;  %p996_p4 = pnand %p995_p1, %p1175_p3 }
  0x3d   : > { %v423_v15 = vsub.f32 1.0, %v422_v13  ;;  %p1001_p11 = por %p1000_p2, %p999_p10 }
  0x3e   : > { %v467_v12 = vmul.f32 %v905_v7, %v466_v10  ;;  %543 = vmatpush.msra.mxu0 %v521_v47  ;;  %p997_p9 = pneg %p996_p4 }
  0x3f   : > { %v424_v17 = vmul.f32 %v907_v11, %v423_v15 }
  0x40   : > { %v468_v14 = vadd.f32 %v905_v7, %v467_v12  ;;  %544 = vmatpush.msra.mxu0 %v520_v48  ;;  %p1002_p12 = pnand %p1001_p11, %p997_p9 }
  0x41   : > { %462 = vadd.xlane.f32.xlu0 %v461_v5  ;;  %v425_v20 = vadd.f32 %v907_v11, %v424_v17  ;;  %v900_v5 = vld [vmem:[%s1356_s5] ss:$0 sm:$0xff] }
  0x42   : > { %v470_v16 = vsel %vm469_vm2, %v905_v7, %v468_v14  ;;  %545 = vmatpush.msra.mxu0 %v519_v51 }
  0x43   : > { %v427_v23 = vsel %vm426_vm3, %v907_v11, %v425_v20 }
  0xa6   : > { %v420_v24 = vpop.xlane.xlu1 %419 }
  0xa7   : > { %v428_v28 = vmul.f32 %v427_v23, %v420_v24  ;;  %v902_v24 = vld [vmem:[#allocation6] ss:$0 sm:$0xff] }
  0xa9   : > { %v1237_v31 = vsub.f32 %v1221_v1, %v428_v28 }
  0xab   : > { %v430_v33 = vmul.f32 %v1237_v31, %v1237_v31 }
  0xac   : > { %v460_v18 = vpop.xlane.xlu0 %459 }
  0xad   : > { %v471_v19 = vmul.f32 %v470_v16, %v460_v18  ;;  %v431_v34 = vsel %vm417_vm1, %v430_v33, 0.0 }
  0xaf   : > { %v1227_v21 = vsub.f32 %v413_v0, %v471_v19  ;;  %v899_v0 = vld [vmem:[%s1355_s4] ss:$0 sm:$0xff] }
  0xb1   : > { %v475_v22 = vmul.f32 %v1227_v21, %v1227_v21 }
  0xb3   : > { %v477_v25 = vsel %vm457_vm0, %v475_v22, 0.0 }
  0xb4   : > { %v463_v26 = vpop.xlane.xlu0 %462  ;;  %478 = vadd.xlane.f32.xlu1 %v477_v25 }
  0xb5   : > { %v472_v27 = vmul.f32 %v470_v16, %v463_v26 }
  0xb7   : > { %v1232_v29 = vsub.f32 %v414_v4, %v472_v27 }
  0xb9   : > { %v476_v30 = vmul.f32 %v1232_v29, %v1232_v29 }
  0xbb   : > { %v480_v32 = vsel %vm457_vm0, %v476_v30, 0.0 }
  0xbc   : > { %481 = vadd.xlane.f32.xlu2 %v480_v32 }
  0xc4   : > { %432 = vadd.xlane.f32.xlu2 %v431_v34 }
 0x127   : > { %v479_v41 = vpop.xlane.xlu1 %478 }
 0x128   : > { %v483_v42 = vmul.f32 %v479_v41, %v470_v16  ;;  %v671_v41 = vld [vmem:[%s1359_s8 + $0x18] sm:$0xff] }
 0x12a   : > { %v485_v44 = vadd.f32 1e-05, %v483_v42  ;;  %v670_v42 = vld [vmem:[%s1359_s8 + $0x10] sm:$0xff] }
 0x12c   : > { %908 = vrsqrt.f32 %v485_v44  ;;  %vm493_vm5 = vweird.f32 %v485_v44 }
 0x12f   : > { %v482_v49 = vpop.xlane.xlu2 %481 }
 0x130   : > { %v484_v50 = vmul.f32 %v482_v49, %v470_v16 }
 0x132   : > { %v909_v52 = vpop.eup %908  ;;  %v486_v53 = vadd.f32 1e-05, %v484_v50 }
 0x133   : > { %v488_v54 = vmul.f32 %v909_v52, %v485_v44  ;;  %vm494_vm4 = vweird.f32 %v909_v52  ;;  %v668_v44 = vld [vmem:[%s1359_s8] sm:$0xff] }
 0x134   : > { %910 = vrsqrt.f32 %v486_v53  ;;  %vm495_vm6 = vmor %vm493_vm5, %vm494_vm4  ;;  %vm503_vm8 = vweird.f32 %v486_v53 }
 0x135   : > { %v489_v55 = vmul.f32 %v909_v52, %v488_v54 }
 0x137   : > { %v490_v56 = vmul.f32 0.5, %v489_v55  ;;  %v433_v57 = vpop.xlane.xlu2 %432 }
 0x138   : > { %v434_v58 = vmul.f32 %v433_v57, %v427_v23 }
 0x139   : > { %v491_v59 = vsub.f32 1.5, %v490_v56 }
 0x13a   : > { %v911_v60 = vpop.eup %910  ;;  %v435_v61 = vadd.f32 1e-05, %v434_v58 }
 0x13b   : > { %v492_v62 = vmul.f32 %v909_v52, %v491_v59  ;;  %v498_v63 = vmul.f32 %v911_v60, %v486_v53  ;;  %vm504_vm7 = vweird.f32 %v911_v60  ;;  %v903_v59 = vld [vmem:[%s1360_s9] ss:$0 sm:$0xff] }
 0x13c   : > { %912 = vrsqrt.f32 %v435_v61  ;;  %vm505_vm9 = vmor %vm503_vm8, %vm504_vm7  ;;  %vm442_vm11 = vweird.f32 %v435_v61 }
 0x13d   : > { %v496_v2 = vsel %vm495_vm6, %v909_v52, %v492_v62  ;;  %v499_v3 = vmul.f32 %v911_v60, %v498_v63 }
 0x13e   : > { %v507_v4 = vmul.f32 %v496_v2, %v1227_v21  ;;  %v901_v21 = vld [vmem:[%s1353_s2] ss:$0 sm:$0xff] }
 0x13f   : > { %v500_v6 = vmul.f32 0.5, %v499_v3 }
 0x140   : > { %v512_v7 = vmul.f32 %v899_v0, %v507_v4 }
 0x141   : > { %v501_v8 = vsub.f32 1.5, %v500_v6 }
 0x142   : > { %v913_v9 = vpop.eup %912  ;;  %v517_v10 = vadd.f32 %v900_v5, %v512_v7 }
 0x143   : > { %v502_v11 = vmul.f32 %v911_v60, %v501_v8  ;;  %v437_v12 = vmul.f32 %v913_v9, %v435_v61  ;;  %vm443_vm10 = vweird.f32 %v913_v9 }
 0x144   : > { %822 = vmatmul.msk.f32.vlgmr.msra.gmra.mxu1 %vm457_vm0, %v517_v10  ;;  %vm444_vm12 = vmor %vm442_vm11, %vm443_vm10 }
 0x145   : > { %v506_v13 = vsel %vm505_vm9, %v911_v60, %v502_v11  ;;  %v438_v14 = vmul.f32 %v913_v9, %v437_v12 }
 0x146   : > { %v508_v15 = vmul.f32 %v506_v13, %v1232_v29 }
 0x147   : > { %v439_v16 = vmul.f32 0.5, %v438_v14 }
 0x148   : > { %v513_v17 = vmul.f32 %v899_v0, %v508_v15 }
 0x149   : > { %v440_v18 = vsub.f32 1.5, %v439_v16 }
 0x14a   : > { %v518_v19 = vadd.f32 %v900_v5, %v513_v17 }
 0x14b   : > { %v441_v20 = vmul.f32 %v913_v9, %v440_v18 }
 0x14c   : > { %823 = vmatmul.msk.f32.gmra.mxu1 %vm457_vm0, %v518_v19 }
 0x14d   : > { %v445_v22 = vsel %vm444_vm12, %v913_v9, %v441_v20 }
 0x14e   : > { %v446_v23 = vmul.f32 %v445_v22, %v1237_v31 }
 0x150   : > { %v450_v25 = vmul.f32 %v901_v21, %v446_v23 }
 0x152   : > { %v454_v26 = vadd.f32 %v902_v24, %v450_v25 }
 0x154   : > { %821 = vmatmul.msk.f32.vlgmr.msra.gmra.mxu0 %vm417_vm1, %v454_v26 }
 0x1c1   : > { %v577_v27 = vpop.f32.mrf.mxu1 }
 0x1c9   : > { %v580_v28 = vpop.f32.mrf.mxu1 }
 0x1ca   : > { %v894_v29 = vpack.i.bf16 %v577_v27, %v580_v28  ;;  %824 = vmatpush.xpose.msk.msra.mxu2 %vm457_vm0, %v580_v28 }
 0x1cc   : > { %895 = vrot.lane.b32.xlu1 %v894_v29, %s1053_s22 }
 0x1ce   : > { %825 = vmatpush.xpose.msk.msra.mxu2 %vm457_vm0, %v577_v27 }
 0x1d1   : > { %v547_v30 = vpop.f32.mrf.mxu0 }
 0x1d2   : > { %826 = vmatmul.msk.f32.vlgmr.msra.gmra.mxu2 %vm457_vm0, %v547_v30 }
 0x23e   : > { %v896_v32 = vpop.permute.xlu1 %895 }
 0x23f   : > { %v897_v33 = vunpack.i.l.bf16 %v896_v32  ;;  %v898_v31 = vunpack.i.h.bf16 %v896_v32 }
 0x241   : > { %645 = vmatpush.msra.mxu3 %v897_v33 }
 0x243   : > { %646 = vmatpush.msra.mxu3 %v898_v31 }
 0x245   : > { %691 = vmatpush.msrb.mxu3 %v671_v41 }
 0x247   : > { %692 = vmatpush.msrb.mxu3 %v670_v42 }
 0x249   : > { %693 = vmatpush.msrb.mxu3 %v669_v43 }
 0x24b   : > { %694 = vmatpush.msrb.mxu3 %v668_v44 }
 0x255   : > { %v609_v34 = vpop.f32.mrf.mxu2 }
 0x256   : > { %v613_v35 = vsel %vm612_vm13, %v609_v34, -inf }
 0x257   : > { %614 = vmax.xlane.f32.xlu0 %v613_v35 }
 0x2ca   : > { %v615_v36 = vpop.xlane.xlu0 %614 }
 0x2cb   : > { %v616_v37 = vsub.f32 %v609_v34, %v615_v36 }
 0x2cd   : > { %v617_v38 = vmul.f32 1.442695, %v616_v37 }
 0x2cf   : > { %914 = vpow2.f32 %v617_v38 }
 0x2d5   : > { %v915_v39 = vpop.eup %914 }
 0x2d6   : > { %827 = vmatmul.msk.f32.vlgmr.msra.gmra.mxu3 %vm612_vm13, %v915_v39  ;;  %v619_v40 = vsel %vm612_vm13, %v915_v39, 0.0 }
 0x2d7   : > { %620 = vadd.xlane.f32.xlu2 %v619_v40 }
 0x34a   : > { %v621_v45 = vpop.xlane.xlu2 %620 }
 0x34b   : > { %916 = vrcp.f32 %v621_v45  ;;  %v662_v49 = vand.u32 2147483648, %v621_v45  ;;  %v660_v51 = vand.u32 2147483647, %v621_v45  ;;  %vm656_vm15 = vweird.f32 %v621_v45 }
 0x34d   : > { %v663_v53 = vor.u32 1.1754944e-38, %v662_v49  ;;  %vm661_vm3 = vcmp.eq.f32.partialorder %v660_v51, 8.507059e+37 }
 0x351   : > { %v917_v46 = vpop.eup %916 }
 0x352   : > { %v652_v47 = vmul.f32 %v917_v46, %v621_v45  ;;  %vm657_vm14 = vweird.f32 %v917_v46 }
 0x353   : > { %vm658_vm2 = vmor %vm656_vm15, %vm657_vm14 }
 0x354   : > { %v653_v48 = vsub.f32 1.0, %v652_v47 }
 0x356   : > { %v654_v50 = vmul.f32 %v917_v46, %v653_v48 }
 0x358   : > { %v655_v52 = vadd.f32 %v917_v46, %v654_v50 }
 0x359   : > { %v648_v55 = vpop.f32.mrf.mxu3 }
 0x35a   : > { %v659_v54 = vsel %vm658_vm2, %v917_v46, %v655_v52 }
 0x35b   : > { %v664_v56 = vsel %vm661_vm3, %v663_v53, %v659_v54 }
 0x35c   : > { %v665_v57 = vmul.f32 %v664_v56, %v648_v55 }
 0x35e   : > { %666 = vst.msk [vmem:[#allocation2] sm:$0xff] %vm457_vm0, %v665_v57 }
 0x365   : > { %v667_v58 = vld [vmem:[#allocation2] sm:$0xff] }
 0x366   : > { %828 = vmatmul.msk.f32.vlgmr.msrb.gmra.mxu3 %vm457_vm0, %v667_v58 }
 0x3e9   : > { %v696_v60 = vpop.f32.mrf.mxu3 }
 0x3ea   : > { %v697_v61 = vadd.f32 %v903_v59, %v696_v60 }
 0x3ec   : > { %v699_v62 = vadd.f32 %v697_v61, %v1221_v1 }
 0x3ee   : > { %700 = vst.msk [vmem:[%s406_s18] sm:$0xff] %vm417_vm1, %v699_v62 }
 0x3ef   : > { %1005 = shalt.err (!%p1002_p12)
}
 0x3f0   : > { %840 = dma.vmem_to_hbm [thread:$0]  (%p1175_p3), %s715_s15, 128, %s717_s24, %s702_s17  }
 0x3f1 PF: > { %s728_s12 = sand.u32 1, %s1036_s13   ;;  %p1375_p13 = scmp.ge.s32.totalorder %s1048_s16, 2 }
 0x3f2   : > { %s729_s3 = scalar_lea.sflag [#allocation5], %s728_s12 }
 0x3f3   : > { %p851_p0 = pnand %p1375_p13, %p1144_p6 }
 0x3f5   : > { %p852_p5 = pneg %p851_p0 }
 0x3f7   : > { %1031 = dma.done.wait (%p852_p5), %s729_s3, 128  }
 0x3f8   : > { %1033 = vsyncadd (%p852_p5), %s729_s3, 4294967168  ;;  %s1376_s16 = sld [smem:[#allocation13_spill]]  ;;  %s1379_s13 = smov %s1040_s14 }
 0x3f9   : > { %s1377_s21 = sld [smem:[#allocation12_spill]] }
 0x3fa   : > { %s1378_s15 = sld [smem:[#allocation14_spill]] }
 0x3fe   : > { %p24_p7 = scmp.ge.s32.totalorder %s1376_s16, 4  }
 0x3ff   : > { %s1380_s14 = smov %s1377_s21 }
 0x400   :  { %26 = sbr.rel (!%p24_p7) target bundleno = 8 (0x8), region = 112 }
 0x405   :  { %735 = vsyncpa [#allocation4], 1 }
 0x406   :  { %737 = vsyncpa [#allocation4 + $0x1], 1 }
 0x407   :  { %738 = vsyncpa [#allocation7], 1 }
 0x408   :  { %739 = vsyncpa [#allocation5], 1 }
 0x409   :  { %741 = vsyncpa [#allocation5 + $0x1], 1 }

</bundles_post_ra>
